<compile_context>
chip_gen: v6e
topology: v6e:2x2x1
jax: 0.10.0
libtpu: 0.0.40
codegen_flags: <defaults>
</compile_context>

<pallas_src>
import functools

import jax
import jax.numpy as jnp
from jax.experimental import pallas as pl
from jax.experimental.pallas import tpu as pltpu

ALPHA = 0.25
GAMMA = 2.0
IGNORE_INDEX = 255

LANES = 128
MAX_BLOCK_R = 4096          # 4096 x 128 f32 block = 2 MiB per input per step
SUBLANE_ALIGN = 32          # satisfies f32 (8), bf16 (16) and int8/uint8 (32) sublane tiling
TARGET_BLOCKS = 4           # aim for >= ~4 grid steps (megacore sharding + pipelining)
MIN_KERNEL_ROWS = 64        # below this (n < 8192) the pure-JAX path is faster than a launch
VMEM_LIMIT_BYTES = 48 * 1024 * 1024   # > v5e's 16 MiB scoped default, < v7x's 64 MiB physical


def _cdiv(a, b):
    return -(-a // b)


def _round_up(x, m):
    return ((x + m - 1) // m) * m


def _seg_loss_partials_kernel(preds_ref, labels_ref, sum_ref, cnt_ref, *,
                              block_r, rows_full, has_partial_tail, ignore_index):
    """One grid step: masked BCE partial sum + valid count folded into (8, 128) vregs."""
    x = preds_ref[...].astype(jnp.float32)
    lab = labels_ref[...]
    valid = lab != ignore_index                     # compare in the label's own dtype

    # Numerically stable BCE with logits: max(x,0) - x*y + log1p(exp(-|x|)).
    # No select on y: for ignored (lab=255) elements the value is finite and masked below.
    bce_raw = (jnp.maximum(x, 0.0) - x * lab.astype(jnp.float32)
               + jnp.log1p(jnp.exp(-jnp.abs(x))))

    def emit(valid_mask):
        # Select (not multiply) so NaN/Inf from garbage in an out-of-bounds partial-block
        # region (or pathological ignored preds) cannot leak into the sum.
        bce = jnp.where(valid_mask, bce_raw, 0.0)
        # Fold (block_r, 128) -> (8, 128) with pure per-vreg VPU adds; the single
        # cross-lane reduce to a scalar happens once, outside the kernel, on a few KB.
        sum_ref[...] = bce.reshape(block_r // 8, 8, LANES).sum(axis=0)
        cnt_ref[...] = valid_mask.astype(jnp.float32).reshape(
            block_r // 8, 8, LANES).sum(axis=0)

    if has_partial_tail:
        i = pl.program_id(0)
        last = pl.num_programs(0) - 1

        @pl.when(i != last)
        def _():
            emit(valid)

        @pl.when(i == last)
        def _():
            # Only the final block overruns the array; mask rows past rows_full.
            row_ids = jax.lax.broadcasted_iota(jnp.int32, (block_r, LANES), 0)
            in_bounds = (i * block_r + row_ids) < rows_full
            emit(jnp.logical_and(valid, in_bounds))
    else:
        emit(valid)


def _bce_partials_jax(p_tail, l_tail, ignore_index):
    """Plain-JAX masked-BCE partial sum/count for tiny tails (< 128 elems or tiny inputs)."""
    x = p_tail.astype(jnp.float32)
    valid = l_tail != ignore_index
    bce = (jnp.maximum(x, 0.0) - x * l_tail.astype(jnp.float32)
           + jnp.log1p(jnp.exp(-jnp.abs(x))))
    s = jnp.sum(jnp.where(valid, bce, 0.0), dtype=jnp.float32)
    c = jnp.sum(valid, dtype=jnp.float32)
    return s, c


def seg_loss(preds, labels, *, alpha=ALPHA, gamma=GAMMA, ignore_index=IGNORE_INDEX):
    """Pallas implementation of SegLoss.forward. Returns a float32 scalar."""
    if labels.dtype == jnp.int8:
        raise ValueError(
            "SegLoss: signed int8 labels cannot represent ignore_index=255; "
            "pass uint8 / int32 / float labels.")

    n = int(preds.size)                      # static (trace-time) element count
    p = preds.reshape(-1)                    # keep original dtypes (no wrapper astype/pad)
    l = labels.reshape(-1)

    n_rem = n % LANES
    n_main = n - n_rem
    rows_full = n_main // LANES

    total = jnp.float32(0.0)
    count = jnp.float32(0.0)

    if rows_full >= MIN_KERNEL_ROWS:
        # Aim for >= ~TARGET_BLOCKS grid steps, capped at MAX_BLOCK_R rows per block.
        block_r = min(MAX_BLOCK_R,
                      _round_up(_cdiv(rows_full, TARGET_BLOCKS), SUBLANE_ALIGN))
        num_blocks = _cdiv(rows_full, block_r)          # partial trailing block allowed
        has_partial_tail = (rows_full % block_r) != 0

        p2 = p[:n_main].reshape(rows_full, LANES)
        l2 = l[:n_main].reshape(rows_full, LANES)

        kernel = functools.partial(
            _seg_loss_partials_kernel,
            block_r=block_r, rows_full=rows_full,
            has_partial_tail=has_partial_tail, ignore_index=ignore_index)

        bytes_in = n_main * (p2.dtype.itemsize + l2.dtype.itemsize)
        bytes_out = 2 * num_blocks * 8 * LANES * 4

        sums, cnts = pl.pallas_call(
            kernel,
            out_shape=(
                jax.ShapeDtypeStruct((num_blocks * 8, LANES), jnp.float32),
                jax.ShapeDtypeStruct((num_blocks * 8, LANES), jnp.float32),
            ),
            grid_spec=pltpu.PrefetchScalarGridSpec(
                num_scalar_prefetch=0,
                grid=(num_blocks,),
                in_specs=[
                    pl.BlockSpec((block_r, LANES), lambda i: (i, 0)),
                    pl.BlockSpec((block_r, LANES), lambda i: (i, 0)),
                ],
                out_specs=[
                    pl.BlockSpec((8, LANES), lambda i: (i, 0)),
                    pl.BlockSpec((8, LANES), lambda i: (i, 0)),
                ],
            ),
            compiler_params=pltpu.CompilerParams(
                dimension_semantics=("parallel",),
                vmem_limit_bytes=VMEM_LIMIT_BYTES),
            cost_estimate=pl.CostEstimate(
                flops=10 * n_main,
                transcendentals=2 * n_main,
                bytes_accessed=int(bytes_in + bytes_out)),
        )(p2, l2)

        total = total + jnp.sum(sums, dtype=jnp.float32)
        count = count + jnp.sum(cnts, dtype=jnp.float32)
        tail_start = n_main
    else:
        tail_start = 0                       # tiny input: everything goes to the JAX path

    if tail_start < n:
        t_sum, t_cnt = _bce_partials_jax(p[tail_start:], l[tail_start:], ignore_index)
        total = total + t_sum
        count = count + t_cnt

    # Tiny scalar focal epilogue (plain JAX on a few KB of partials).
    mean_bce = total / count            # NaN if every element is ignored (matches PyTorch)
    logpt = -mean_bce
    pt = jnp.exp(logpt)
    one_minus_pt = 1.0 - pt
    if gamma == 2.0:
        focal = one_minus_pt * one_minus_pt      # explicit square: avoids pow's exp/log pair
    else:
        focal = one_minus_pt ** gamma
    return -focal * alpha * logpt


def _seg_loss_ref(preds, labels, *, alpha=ALPHA, gamma=GAMMA, ignore_index=IGNORE_INDEX):
    p = preds.reshape(-1).astype(jnp.float32)
    l = labels.reshape(-1).astype(jnp.float32)
    valid = l != ignore_index
    y = jnp.where(valid, l, 0.0)
    bce = jnp.maximum(p, 0.0) - p * y + jnp.log1p(jnp.exp(-jnp.abs(p)))
    mean_bce = jnp.sum(jnp.where(valid, bce, 0.0)) / jnp.sum(valid)
    logpt = -mean_bce
    pt = jnp.exp(logpt)
    return -((1.0 - pt) ** gamma) * alpha * logpt


if __name__ == "__main__":
    # Test 1: block-aligned segmentation-style input (2 x 64 x 64 = 8192 px -> 64 rows
    # -> two 32-row blocks, no padding, no tail mask).
    key = jax.random.PRNGKey(0)
    k1, k2, k3 = jax.random.split(key, 3)
    shape = (2, 64, 64)
    preds = jax.random.normal(k1, shape, dtype=jnp.float32)
    labels = jax.random.bernoulli(k2, p=0.5, shape=shape).astype(jnp.float32)
    ignore_mask = jax.random.bernoulli(k3, p=0.1, shape=shape)
    labels = jnp.where(ignore_mask, float(IGNORE_INDEX), labels)

    loss = jax.block_until_ready(seg_loss(preds, labels))
    ref = jax.block_until_ready(_seg_loss_ref(preds, labels))
    assert jnp.allclose(loss, ref, rtol=1e-5, atol=1e-6), (loss, ref)

    # Test 2: misaligned input (2 x 75 x 61 = 9150 px -> 71 full rows: partial trailing
    # block masked in-kernel, plus a 62-element remainder handled in the JAX epilogue).
    k4, k5, k6 = jax.random.split(jax.random.PRNGKey(1), 3)
    shape2 = (2, 75, 61)
    preds2 = jax.random.normal(k4, shape2, dtype=jnp.float32)
    labels2 = jax.random.bernoulli(k5, p=0.5, shape=shape2).astype(jnp.float32)
    labels2 = jnp.where(jax.random.bernoulli(k6, p=0.1, shape=shape2),
                        float(IGNORE_INDEX), labels2)

    loss2 = jax.block_until_ready(seg_loss(preds2, labels2))
    ref2 = jax.block_until_ready(_seg_loss_ref(preds2, labels2))
    assert jnp.allclose(loss2, ref2, rtol=1e-5, atol=1e-6), (loss2, ref2)

    print("KERNEL_OK")
</pallas_src>

<mosaic_0001>
module attributes {stable_mosaic.version = 11 : i64} {
  func.func @_seg_loss_partials_kernel(%arg0: i32, %arg1: memref<32x128xf32, #tpu.memory_space<vmem>>, %arg2: memref<32x128xf32, #tpu.memory_space<vmem>>, %arg3: memref<8x128xf32, #tpu.memory_space<vmem>>, %arg4: memref<8x128xf32, #tpu.memory_space<vmem>>) attributes {dimension_semantics = [#tpu.dimension_semantics<parallel>], iteration_bounds = array<i64: 2>, scalar_prefetch = 0 : i64, scratch_operands = 0 : i64, tpu.core_type = #tpu.core_type<tc>, window_params = [{transform_indices = @transform_0, window_bounds = array<i64: 32, 128>}, {transform_indices = @transform_1, window_bounds = array<i64: 32, 128>}, {transform_indices = @transform_2, window_bounds = array<i64: 8, 128>}, {transform_indices = @transform_3, window_bounds = array<i64: 8, 128>}]} {
    %c0 = arith.constant 0 : index
    %c0_0 = arith.constant 0 : index
    %0 = vector.load %arg1[%c0, %c0_0] : memref<32x128xf32, #tpu.memory_space<vmem>>, vector<32x128xf32>
    %c0_1 = arith.constant 0 : index
    %c0_2 = arith.constant 0 : index
    %1 = vector.load %arg2[%c0_1, %c0_2] : memref<32x128xf32, #tpu.memory_space<vmem>>, vector<32x128xf32>
    %cst = arith.constant 2.550000e+02 : f32
    %2 = vector.broadcast %cst : f32 to vector<32x128xf32>
    %3 = arith.cmpf one, %1, %2 : vector<32x128xf32>
    %cst_3 = arith.constant 0.000000e+00 : f32
    %4 = vector.broadcast %cst_3 : f32 to vector<32x128xf32>
    %5 = arith.maximumf %0, %4 : vector<32x128xf32>
    %6 = arith.mulf %0, %1 : vector<32x128xf32>
    %7 = arith.subf %5, %6 : vector<32x128xf32>
    %8 = math.absf %0 : vector<32x128xf32>
    %cst_4 = arith.constant 0.000000e+00 : f32
    %9 = vector.broadcast %cst_4 : f32 to vector<32x128xf32>
    %10 = arith.subf %9, %8 : vector<32x128xf32>
    %11 = math.exp %10 : vector<32x128xf32>
    %12 = math.log1p %11 : vector<32x128xf32>
    %13 = arith.addf %7, %12 : vector<32x128xf32>
    %cst_5 = arith.constant 0.000000e+00 : f32
    %14 = vector.broadcast %cst_5 : f32 to vector<32x128xf32>
    %15 = arith.select %3, %13, %14 : vector<32x128xi1>, vector<32x128xf32>
    %16 = vector.shape_cast %15 : vector<32x128xf32> to vector<4x8x128xf32>
    %cst_6 = arith.constant dense<0.000000e+00> : vector<8x128xf32>
    %17 = vector.multi_reduction <add>, %16, %cst_6 [0] : vector<4x8x128xf32> to vector<8x128xf32>
    %c0_7 = arith.constant 0 : index
    %c0_8 = arith.constant 0 : index
    %18 = vector.load %arg3[%c0_7, %c0_8] : memref<8x128xf32, #tpu.memory_space<vmem>>, vector<8x128xf32>
    tpu.vector_store %arg3[%c0_7, %c0_8], %17 {strides = array<i32>} : memref<8x128xf32, #tpu.memory_space<vmem>>, vector<8x128xf32>,
    %19 = arith.extui %3 : vector<32x128xi1> to vector<32x128xi32>
    %20 = arith.sitofp %19 : vector<32x128xi32> to vector<32x128xf32>
    %21 = vector.shape_cast %20 : vector<32x128xf32> to vector<4x8x128xf32>
    %cst_9 = arith.constant dense<0.000000e+00> : vector<8x128xf32>
    %22 = vector.multi_reduction <add>, %21, %cst_9 [0] : vector<4x8x128xf32> to vector<8x128xf32>
    %c0_10 = arith.constant 0 : index
    %c0_11 = arith.constant 0 : index
    %23 = vector.load %arg4[%c0_10, %c0_11] : memref<8x128xf32, #tpu.memory_space<vmem>>, vector<8x128xf32>
    tpu.vector_store %arg4[%c0_10, %c0_11], %22 {strides = array<i32>} : memref<8x128xf32, #tpu.memory_space<vmem>>, vector<8x128xf32>,
    return
  }
  func.func @transform_0(%arg0: i32) -> (i32, i32) {
    %c0_i32 = arith.constant 0 : i32
    %c0_i32_0 = arith.constant 0 : i32
    return %arg0, %c0_i32 : i32, i32
  }
  func.func @transform_1(%arg0: i32) -> (i32, i32) {
    %c0_i32 = arith.constant 0 : i32
    %c0_i32_0 = arith.constant 0 : i32
    return %arg0, %c0_i32 : i32, i32
  }
  func.func @transform_2(%arg0: i32) -> (i32, i32) {
    %c0_i32 = arith.constant 0 : i32
    %c0_i32_0 = arith.constant 0 : i32
    return %arg0, %c0_i32 : i32, i32
  }
  func.func @transform_3(%arg0: i32) -> (i32, i32) {
    %c0_i32 = arith.constant 0 : i32
    %c0_i32_0 = arith.constant 0 : i32
    return %arg0, %c0_i32 : i32, i32
  }
}

</mosaic_0001>

<bundles_post_ra>
// kernel: tpu_custom_call.1
= control target key start
LH: loop header
LB: loop body
LE: loop exit
PB: predicated region body
PF: predicated region fallthrough
CT: control target
= control target key end

     0   :  { %9 = vsyncpa [#allocation3], 0  ;;  %s1082_s0 = inlined_call_operand.hbm [shape: f32[64,128], index: 0, kind: input, shape index: {}]   ;;  %s1083_s1 = inlined_call_operand.hbm [shape: f32[64,128], index: 1, kind: input, shape index: {}]   ;;  %s1084_s2 = inlined_call_operand.hbm [shape: f32[16,128], index: 2, kind: output, shape index: {0}]   ;;  %s1085_s3 = inlined_call_operand.hbm [shape: f32[16,128], index: 3, kind: output, shape index: {1}]  }
   0x1   :  { %11 = vsyncpa [#allocation3 + $0x1], 0 }
   0x2   :  { %12 = vsyncpa [#allocation6], 0 }
   0x3   :  { %14 = vsyncpa [#allocation6 + $0x1], 0 }
   0x4   :  { %15 = vsyncpa [#allocation4], 0 }
   0x5   :  { %17 = vsyncpa [#allocation4 + $0x1], 0 }
   0x6   :  { %18 = vsyncpa [#allocation9], 0 }
   0x7   :  { %20 = vsyncpa [#allocation9 + $0x1], 0  ;;  %s783_s12 = smov 0   ;;  %s785_s13 = smov 0  }
   0x8   :  { %s787_s14 = smov 0   ;;  %s789_s15 = smov 0  }
   0x9 LB: > { %s804_s16 = sadd.s32 4294967295, %s754_s15   ;;  %s499_s17 = sadd.s32 4294967294, %s754_s15   ;;  %s754_s15 = sphi %s789_s15, %s1105_s15   ;;  %s750_s14 = sphi %s787_s14, %s1104_s14   ;;  %s746_s13 = sphi %s785_s13, %s1103_s13   ;;  %s742_s12 = sphi %s783_s12, %s1102_s12  }
   0xa   : > { %s808_s18 = sadd.s32 1, %s754_s15   ;;  %s33_s19 = sadd.s32 1, %s750_s14 }
   0xb   : > { %s30_s20 = ssub.s32 %s754_s15, %s808_s18  ;;  %p40_p0 = scmp.ne.s32.totalorder %s750_s14, %s746_s13 }
   0xc   : > { %p31_p1 = scmp.eq.s32.totalorder %s30_s20, 0  ;;  %p41_p2 = scmp.eq.s32.totalorder %s754_s15, 0 }
   0xd   : > { %p46_p3 = scmp.ne.s32.totalorder %s746_s13, %s742_s12  ;;  %p47_p4 = scmp.eq.s32.totalorder %s804_s16, 0 }
   0xe   : > { %s820_s21 = scalar_select %p31_p1, %s750_s14, %s33_s19  }
   0xf   : > { %p822_p5 = por %p41_p2, %p40_p0  ;;  %p826_p6 = por %p47_p4, %p46_p3 }
  0x10   : > { %p96_p7 = scmp.eq.s32.totalorder %s804_s16, 1  ;;  %p102_p8 = scmp.eq.s32.totalorder %s499_s17, 1 }
  0x11   : > { %s1089_s23 = scalar_select %p826_p6, 1, 0 }
  0x12   : > { %p547_p10 = scmp.lt.s32.totalorder %s754_s15, 2  ;;  %p833_p11 = por %p96_p7, %p40_p0 }
  0x13   : > { %p837_p12 = por %p102_p8, %p46_p3  ;;  %s842_s26 = sand.u32 1, %s750_s14  }
  0x14   : > { %s1090_s24 = scalar_select %p833_p11, 1, 0 }
  0x15   : > { %s1091_s25 = scalar_select %p837_p12, 1, 0 }
  0x16   : > { %s523_s27 = sshll.u32 %s754_s15, 9  ;;  %s502_s28 = sshll.u32 %s842_s26, 5 }
  0x17   : > { %s851_s4 = scalar_lea.hbm %s1082_s0, %s523_s27  ;;  %s152_s5 = scalar_lea.vmem [#allocation2], %s502_s28 }
  0x18   : > { %s159_s6 = sshll.u32 %s152_s5, 4  ;;  %p857_p13 = pnand %p547_p10, %p822_p5  ;;  %s861_s6 = int_to_ptr.vmem [resolvable:$true] %s159_s6 }
  0x19   : > { %s149_s8 = scalar_lea.sflag [#allocation3], %s842_s26  ;;  %s600_s9 = scalar_lea.hbm %s851_s4, 512 }
  0x1a   : > { %p601_p0 = scmp.ne.s32.totalorder %s851_s4, %s600_s9  ;;  %p602_p1 = pneg %p857_p13 }
  0x1b   : > { %s605_s17 = scalar_lea.hbm %s1082_s0, 1024  ;;  %p606_p4 = scmp.lt.s32.totalorder %s851_s4, %s1082_s0 }
  0x1c   : > { %p603_p2 = pnand %p602_p1, %p601_p0  ;;  %p607_p5 = scmp.lt.s32.totalorder %s605_s17, %s600_s9 }
  0x1e   : > { %p604_p3 = pneg %p603_p2  ;;  %p608_p7 = por %p607_p5, %p606_p4 }
  0x20   : > { %p609_p8 = pnand %p608_p7, %p604_p3 }
  0x22   : > { %612 = shalt.err (!%p609_p8)
}
  0x23   : > { %s613_s22 = scalar_lea.vmem %s861_s6, 512  ;;  %s756_s29 = smov [#allocation2]  }
  0x24   : > { %p614_p10 = scmp.ne.s32.totalorder %s861_s6, %s613_s22  ;;  %s618_s30 = sshll.u32 %s756_s29, 4  ;;  %s619_s30 = int_to_ptr.vmem [resolvable:$false] %s618_s30 }
  0x25   : > { %s620_s5 = scalar_lea.vmem %s619_s30, 1024  ;;  %p621_p9 = scmp.lt.s32.totalorder %s861_s6, %s619_s30 }
  0x26   : > { %p616_p0 = pnand %p614_p10, %p602_p1  ;;  %p622_p12 = scmp.lt.s32.totalorder %s620_s5, %s613_s22 }
  0x28   : > { %p617_p2 = pneg %p616_p0  ;;  %p623_p11 = por %p622_p12, %p621_p9 }
  0x2a   : > { %p624_p4 = pnand %p623_p11, %p617_p2 }
  0x2c   : > { %627 = shalt.err (!%p624_p4)
}
  0x2d   : > { %s757_s9 = smov 128   ;;  %s758_s10 = smov 8  }
  0x2e   : > { %536 = dma.hbm_to_vmem [thread:$0]  (!%p857_p13), %s851_s4, 512, %s861_s6, %s149_s8, %s757_s9, %s757_s9, %s758_s10  }
  0x2f   : > { %p508_p9 = scmp.ge.s32.totalorder %s754_s15, 1  ;;  %p188_p11 = scmp.lt.s32.totalorder %s754_s15, 3 }
  0x30   : > { %s904_s20 = scalar_lea.hbm %s1083_s1, %s523_s27  ;;  %s173_s22 = scalar_lea.vmem [#allocation5], %s502_s28 }
  0x31   : > { %p895_p12 = pnand %p508_p9, %p188_p11  ;;  %s180_s29 = sshll.u32 %s173_s22, 4  ;;  %s908_s29 = int_to_ptr.vmem [resolvable:$true] %s180_s29 }
  0x32   : > { %s170_s4 = scalar_lea.sflag [#allocation6], %s842_s26  ;;  %s628_s6 = scalar_lea.hbm %s904_s20, 512 }
  0x33   : > { %p629_p3 = scmp.ne.s32.totalorder %s904_s20, %s628_s6  ;;  %s633_s27 = scalar_lea.hbm %s1083_s1, 1024 }
  0x34   : > { %p634_p8 = scmp.lt.s32.totalorder %s904_s20, %s1083_s1  ;;  %p635_p10 = scmp.lt.s32.totalorder %s633_s27, %s628_s6 }
  0x35   : > { %p631_p5 = pnand %p629_p3, %p602_p1 }
  0x36   : > { %p636_p0 = por %p635_p10, %p634_p8 }
  0x37   : > { %p632_p7 = pneg %p631_p5 }
  0x39   : > { %p637_p2 = pnand %p636_p0, %p632_p7 }
  0x3b   : > { %640 = shalt.err (!%p637_p2)
}
  0x3c   : > { %s641_s26 = scalar_lea.vmem %s908_s29, 512  ;;  %s759_s28 = smov [#allocation5]  }
  0x3d   : > { %p642_p4 = scmp.ne.s32.totalorder %s908_s29, %s641_s26  ;;  %s646_s19 = sshll.u32 %s759_s28, 4  ;;  %s647_s19 = int_to_ptr.vmem [resolvable:$false] %s646_s19 }
  0x3e   : > { %s648_s22 = scalar_lea.vmem %s647_s19, 1024  ;;  %p649_p3 = scmp.lt.s32.totalorder %s908_s29, %s647_s19 }
  0x3f   : > { %p644_p9 = pnand %p642_p4, %p602_p1  ;;  %p650_p5 = scmp.lt.s32.totalorder %s648_s22, %s641_s26 }
  0x41   : > { %p645_p11 = pneg %p644_p9  ;;  %p651_p6 = por %p650_p5, %p649_p3 }
  0x43   : > { %p652_p8 = pnand %p651_p6, %p645_p11 }
  0x45   : > { %655 = shalt.err (!%p652_p8)
}
  0x46   : > { %539 = dma.hbm_to_vmem [thread:$0]  (!%p857_p13), %s904_s20, 512, %s908_s29, %s170_s4, %s757_s9, %s757_s9, %s758_s10  }
  0x47   : > { %192 = sbr.rel (%p895_p12) target bundleno = 148 (0x94), region = 28  ;;  %s939_s6 = sand.u32 (!%p895_p12), 1, %s746_s13  }
  0x48   : > { %s509_s8 = sshll.u32 (!%p895_p12), %s939_s6, 5  ;;  %s195_s30 = scalar_lea.sflag (!%p895_p12), [#allocation3], %s939_s6 }
  0x49   : > { %s198_s27 = scalar_lea.vmem (!%p895_p12), [#allocation2], %s509_s8  ;;  %p1094_p6 = scmp.ne.s32.totalorder (!%p895_p12), %s1089_s23, 0 }
  0x4c   : > { %725 = dma.done.wait (%p1094_p6), %s195_s30, 512  }
  0x4d   : > { %727 = vsyncadd (%p1094_p6), %s195_s30, 4294966784  ;;  %s204_s7 = scalar_lea.sflag [#allocation6], %s939_s6  ;;  %s207_s9 = scalar_lea.vmem [#allocation5], %s509_s8 }
  0x4e   : > { %729 = dma.done.wait (%p1094_p6), %s204_s7, 512  }
  0x4f   : > { %731 = vsyncadd (%p1094_p6), %s204_s7, 4294966784  ;;  %v952_v0 = vld [vmem:[%s198_s27] sm:$0xff]  ;;  %v954_v1 = vld [vmem:[%s198_s27 + $0x8] sm:$0xff]  ;;  %s511_s10 = sshll.u32 %s939_s6, 3  ;;  %v760_v14 = vmov 0.0   ;;  %s519_s20 = sshll.u32 %s804_s16, 7 }
  0x50   : > { %v957_v2 = vld [vmem:[%s198_s27 + $0x10] sm:$0xff]  ;;  %v959_v3 = vld [vmem:[%s198_s27 + $0x18] sm:$0xff]  ;;  %v961_v4 = vld [vmem:[%s207_s9] sm:$0xff]  ;;  %v266_v7 = vand.u32 2147483647, %v952_v0  ;;  %s239_s23 = scalar_lea.vmem [#allocation8], %s511_s10  ;;  %s372_s5 = scalar_lea.hbm %s1085_s3, %s519_s20 }
  0x51   : > { %v963_v5 = vld [vmem:[%s207_s9 + $0x8] sm:$0xff]  ;;  %v965_v6 = vld [vmem:[%s207_s9 + $0x10] sm:$0xff]  ;;  %vm250_vm0 = vcmp.ne.f32.partialorder %v961_v4, 255.0  ;;  %v267_v8 = vand.u32 2147483647, %v954_v1  ;;  %v972_v9 = vld [vmem:[%s207_s9 + $0x18] sm:$0xff] }
  0x52   : > { %vm251_vm1 = vcmp.ne.f32.partialorder %v963_v5, 255.0  ;;  %vm252_vm2 = vcmp.ne.f32.partialorder %v965_v6, 255.0  ;;  %v268_v10 = vand.u32 2147483647, %v957_v2  ;;  %v269_v11 = vand.u32 2147483647, %v959_v3 }
  0x53   : > { %vm253_vm3 = vcmp.ne.f32.partialorder %v972_v9, 255.0  ;;  %v270_v12 = vsub.f32 0.0, %v266_v7  ;;  %v271_v13 = vsub.f32 0.0, %v267_v8  ;;  %v513_v15 = vsel %vm250_vm0, 1.0, %v760_v14  ;;  %s374_s11 = sshll.u32 %s239_s23, 4  ;;  %s348_s17 = scalar_lea.sflag [#allocation9], %s939_s6  ;;  %s988_s11 = int_to_ptr.vmem [resolvable:$true] %s374_s11 }
  0x54   : > { %v272_v16 = vsub.f32 0.0, %v268_v10  ;;  %v273_v17 = vsub.f32 0.0, %v269_v11  ;;  %v514_v18 = vsel %vm251_vm1, 1.0, %v760_v14  ;;  %v515_v19 = vsel %vm252_vm2, 1.0, %v760_v14  ;;  %s656_s26 = scalar_lea.vmem %s988_s11, 128  ;;  %p1095_p1 = scmp.ne.s32.totalorder %s1090_s24, 0 }
  0x55   : > { %v274_v20 = vmul.f32 1.442695, %v270_v12  ;;  %v276_v21 = vmul.f32 1.442695, %v271_v13  ;;  %v338_v22 = vadd.f32 %v514_v18, %v513_v15  ;;  %v516_v25 = vsel %vm253_vm3, 1.0, %v760_v14  ;;  %p657_p13 = scmp.ne.s32.totalorder %s988_s11, %s656_s26  ;;  %s761_s28 = smov [#allocation8]  }
  0x56   : > { %v278_v23 = vmul.f32 1.442695, %v272_v16  ;;  %v280_v24 = vmul.f32 1.442695, %v273_v17  ;;  %s660_s19 = sshll.u32 %s761_s28, 4  ;;  %s661_s19 = int_to_ptr.vmem [resolvable:$false] %s660_s19 }
  0x57   : > { %584 = vpow2.f32 %v274_v20  ;;  %v339_v26 = vadd.f32 %v515_v19, %v338_v22  ;;  %p658_p12 = pnand %p657_p13, %p1095_p1  ;;  %s662_s22 = scalar_lea.vmem %s661_s19, 256 }
  0x58   : > { %586 = vpow2.f32 %v276_v21  ;;  %p663_p10 = scmp.lt.s32.totalorder %s988_s11, %s661_s19  ;;  %p664_p0 = scmp.lt.s32.totalorder %s662_s22, %s656_s26 }
  0x59   : > { %588 = vpow2.f32 %v278_v23  ;;  %v340_v27 = vadd.f32 %v516_v25, %v339_v26  ;;  %p659_p7 = pneg %p658_p12 }
  0x5a   : > { %590 = vpow2.f32 %v280_v24  ;;  %p665_p2 = por %p664_p0, %p663_p10 }
  0x5b   : > { %341 = vst [vmem:[%s239_s23] sm:$0xff] %v340_v27 }
  0x5c   : > { %p666_p4 = pnand %p665_p2, %p659_p7 }
  0x5e   : > { %669 = shalt.err (!%p666_p4)
}
  0x5f   : > { %s670_s8 = scalar_lea.hbm %s372_s5, 128  ;;  %s674_s7 = scalar_lea.hbm %s1085_s3, 256 }
  0x60   : > { %p671_p9 = scmp.ne.s32.totalorder %s372_s5, %s670_s8  ;;  %p675_p5 = scmp.lt.s32.totalorder %s372_s5, %s1085_s3 }
  0x61   : > { %p676_p8 = scmp.lt.s32.totalorder %s674_s7, %s670_s8 }
  0x62   : > { %p672_p11 = pnand %p671_p9, %p1095_p1 }
  0x63   : > { %p677_p6 = por %p676_p8, %p675_p5 }
  0x64   : > { %p673_p3 = pneg %p672_p11 }
  0x66   : > { %p678_p13 = pnand %p677_p6, %p673_p3 }
  0x68   : > { %681 = shalt.err (!%p678_p13)
}
  0x69   : > { %530 = dma.vmem_to_hbm [thread:$0]  (%p1095_p1), %s988_s11, 128, %s372_s5, %s348_s17   ;;  %v585_v28 = vpop.eup %584  ;;  %v254_v41 = vmax.f32 %v952_v0, 0.0  ;;  %v258_v42 = vmul.f32 %v961_v4, %v952_v0  ;;  %v255_v45 = vmax.f32 %v954_v1, 0.0  ;;  %v259_v46 = vmul.f32 %v963_v5, %v954_v1 }
  0x6a   : > { %v587_v29 = vpop.eup %586  ;;  %v282_v30 = vadd.f32 1.0, %v585_v28  ;;  %v285_v36 = vmul.f32 -0.5, %v585_v28  ;;  %v288_v43 = vand.u32 2147483647, %v585_v28  ;;  %v256_v49 = vmax.f32 %v957_v2, 0.0  ;;  %s232_s11 = scalar_lea.vmem [#allocation7], %s511_s10  ;;  %s359_s17 = scalar_lea.hbm %s1084_s2, %s519_s20 }
  0x6b   : > { %v589_v31 = vpop.eup %588  ;;  %v291_v32 = vadd.f32 1.0, %v587_v29  ;;  %v294_v37 = vmul.f32 -0.5, %v587_v29  ;;  %v297_v47 = vand.u32 2147483647, %v587_v29  ;;  %v260_v50 = vmul.f32 %v965_v6, %v957_v2  ;;  %s361_s29 = sshll.u32 %s232_s11, 4  ;;  %s343_s26 = scalar_lea.sflag [#allocation4], %s939_s6  ;;  %s362_s29 = int_to_ptr.vmem [resolvable:$true] %s361_s29 }
  0x6c   : > { %v591_v33 = vpop.eup %590  ;;  %592 = vlog2.f32 %v282_v30  ;;  %v300_v34 = vadd.f32 1.0, %v589_v31  ;;  %v303_v38 = vmul.f32 -0.5, %v589_v31  ;;  %v286_v39 = vadd.f32 1.0, %v285_v36  ;;  %s682_s28 = scalar_lea.vmem %s362_s29, 128  ;;  %s762_s10 = smov [#allocation7]  }
  0x6d   : > { %594 = vlog2.f32 %v291_v32  ;;  %v309_v35 = vadd.f32 1.0, %v591_v33  ;;  %v312_v40 = vmul.f32 -0.5, %v591_v33  ;;  %v295_v44 = vadd.f32 1.0, %v294_v37  ;;  %p683_p12 = scmp.ne.s32.totalorder %s362_s29, %s682_s28  ;;  %s686_s19 = sshll.u32 %s762_s10, 4  ;;  %s687_s19 = int_to_ptr.vmem [resolvable:$false] %s686_s19 }
  0x6e   : > { %596 = vlog2.f32 %v300_v34  ;;  %v304_v48 = vadd.f32 1.0, %v303_v38  ;;  %v306_v51 = vand.u32 2147483647, %v589_v31  ;;  %v257_v52 = vmax.f32 %v959_v3, 0.0  ;;  %s688_s22 = scalar_lea.vmem %s687_s19, 256  ;;  %p689_p0 = scmp.lt.s32.totalorder %s362_s29, %s687_s19 }
  0x6f   : > { %598 = vlog2.f32 %v309_v35  ;;  %v261_v53 = vmul.f32 %v972_v9, %v959_v3  ;;  %v287_v54 = vmul.f32 %v585_v28, %v286_v39  ;;  %v313_v55 = vadd.f32 1.0, %v312_v40  ;;  %p684_p7 = pnand %p683_p12, %p1095_p1  ;;  %p690_p2 = scmp.lt.s32.totalorder %s688_s22, %s682_s28 }
  0x70   : > { %v262_v57 = vsub.f32 %v254_v41, %v258_v42  ;;  %vm1024_vm4 = vcmp.lt.f32.partialorder %v288_v43, 0.0004427343  ;;  %v296_v59 = vmul.f32 %v587_v29, %v295_v44  ;;  %v315_v60 = vand.u32 2147483647, %v591_v33 }
  0x71   : > { %v263_v62 = vsub.f32 %v255_v45, %v259_v46  ;;  %vm1028_vm5 = vcmp.lt.f32.partialorder %v297_v47, 0.0004427343  ;;  %v305_v1 = vmul.f32 %v589_v31, %v304_v48  ;;  %v264_v3 = vsub.f32 %v256_v49, %v260_v50  ;;  %p685_p10 = pneg %p684_p7  ;;  %p691_p4 = por %p690_p2, %p689_p0 }
  0x72   : > { %vm307_vm6 = vcmp.lt.f32.partialorder %v306_v51, 0.0004427343  ;;  %v314_v11 = vmul.f32 %v591_v33, %v313_v55  ;;  %v265_v13 = vsub.f32 %v257_v52, %v261_v53  ;;  %vm316_vm7 = vcmp.lt.f32.partialorder %v315_v60, 0.0004427343 }
  0x73   : > { %p692_p9 = pnand %p691_p4, %p685_p10 }
  0x79   : > { %v593_v56 = vpop.eup %592 }
  0x7a   : > { %v595_v61 = vpop.eup %594  ;;  %v284_v63 = vmul.f32 0.6931472, %v593_v56 }
  0x7b   : > { %v597_v2 = vpop.eup %596  ;;  %v293_v7 = vmul.f32 0.6931472, %v595_v61 }
  0x7c   : > { %v290_v8 = vsel %vm1024_vm4, %v287_v54, %v284_v63  ;;  %v302_v10 = vmul.f32 0.6931472, %v597_v2  ;;  %v599_v12 = vpop.eup %598 }
  0x7d   : > { %v299_v14 = vsel %vm1028_vm5, %v296_v59, %v293_v7  ;;  %v318_v15 = vadd.f32 %v290_v8, %v262_v57  ;;  %v311_v17 = vmul.f32 0.6931472, %v599_v12 }
  0x7e   : > { %v308_v16 = vsel %vm307_vm6, %v305_v1, %v302_v10  ;;  %v319_v18 = vadd.f32 %v299_v14, %v263_v62 }
  0x7f   : > { %v320_v19 = vadd.f32 %v308_v16, %v264_v3  ;;  %v322_v20 = vsel %vm250_vm0, %v318_v15, 0.0  ;;  %v317_v21 = vsel %vm316_vm7, %v314_v11, %v311_v17 }
  0x80   : > { %v323_v22 = vsel %vm251_vm1, %v319_v18, 0.0  ;;  %v321_v23 = vadd.f32 %v317_v21, %v265_v13 }
  0x81   : > { %v324_v24 = vsel %vm252_vm2, %v320_v19, 0.0  ;;  %v326_v25 = vadd.f32 %v323_v22, %v322_v20 }
  0x82   : > { %v325_v26 = vsel %vm253_vm3, %v321_v23, 0.0 }
  0x83   : > { %v327_v27 = vadd.f32 %v326_v25, %v324_v24 }
  0x85   : > { %v328_v28 = vadd.f32 %v327_v27, %v325_v26 }
  0x87   : > { %329 = vst [vmem:[%s232_s11] sm:$0xff] %v328_v28 }
  0x88   : > { %695 = shalt.err (!%p692_p9)
}
  0x89   : > { %s696_s16 = scalar_lea.hbm %s359_s17, 128  ;;  %s700_s8 = scalar_lea.hbm %s1084_s2, 256 }
  0x8a   : > { %p697_p11 = scmp.ne.s32.totalorder %s359_s17, %s696_s16  ;;  %p701_p8 = scmp.lt.s32.totalorder %s359_s17, %s1084_s2 }
  0x8b   : > { %p702_p6 = scmp.lt.s32.totalorder %s700_s8, %s696_s16 }
  0x8c   : > { %p698_p3 = pnand %p697_p11, %p1095_p1 }
  0x8d   : > { %p703_p13 = por %p702_p6, %p701_p8 }
  0x8e   : > { %p699_p5 = pneg %p698_p3 }
  0x90   : > { %p704_p12 = pnand %p703_p13, %p699_p5 }
  0x92   : > { %707 = shalt.err (!%p704_p12)
}
  0x93   : > { %529 = dma.vmem_to_hbm [thread:$0]  (%p1095_p1), %s362_s29, 128, %s359_s17, %s343_s26  }
  0x94 PF: > { %s386_s7 = sand.u32 1, %s742_s12   ;;  %p1100_p7 = scmp.ne.s32.totalorder %s1091_s25, 0 }
  0x95   : > { %p1101_p10 = scmp.ge.s32.totalorder %s754_s15, 2  ;;  %s387_s9 = scalar_lea.sflag [#allocation4], %s386_s7 }
  0x97   : > { %p541_p0 = pnand %p1101_p10, %p1100_p7 }
  0x99   : > { %p542_p2 = pneg %p541_p0 }
  0x9b   : > { %733 = dma.done.wait (%p542_p2), %s387_s9, 128  }
  0x9c   : > { %735 = vsyncadd (%p542_p2), %s387_s9, 4294967168  ;;  %s396_s23 = scalar_lea.sflag [#allocation9], %s386_s7 }
  0x9d   : > { %737 = dma.done.wait (%p542_p2), %s396_s23, 128  }
  0x9e   : > { %739 = vsyncadd (%p542_p2), %s396_s23, 4294967168  ;;  %p23_p1 = scmp.ge.s32.totalorder %s808_s18, 4   ;;  %s1102_s12 = smov %s746_s13 }
  0x9f   : > { %s1103_s13 = smov %s750_s14  ;;  %s1104_s14 = smov %s820_s21 }
  0xa0   : > { %s1105_s15 = smov %s808_s18  ;;  %25 = sbr.rel (!%p23_p1) target bundleno = 9 (0x9), region = 103 }
  0xa5   :  { %401 = vsyncpa [#allocation3], 1 }
  0xa6   :  { %403 = vsyncpa [#allocation3 + $0x1], 1 }
  0xa7   :  { %404 = vsyncpa [#allocation6], 1 }
  0xa8   :  { %406 = vsyncpa [#allocation6 + $0x1], 1 }
  0xa9   :  { %407 = vsyncpa [#allocation4], 1 }
  0xaa   :  { %409 = vsyncpa [#allocation4 + $0x1], 1 }
  0xab   :  { %410 = vsyncpa [#allocation9], 1 }
  0xac   :  { %412 = vsyncpa [#allocation9 + $0x1], 1 }

</bundles_post_ra>
